<compile_context>
chip_gen: v5e
topology: v5e:2x2
jax: 0.10.0
libtpu: 0.0.40
codegen_flags: <defaults>
</compile_context>

<pallas_src>
import jax
import jax.numpy as jnp
from jax import lax
from jax.experimental import pallas as pl
from jax.experimental.pallas import tpu as pltpu


def _round_up(v, m):
    return ((v + m - 1) // m) * m


def discriminator_kernel(x_ref, w1_ref, b1_ref, w2_ref, b2_ref, o_ref):
    # Layer 1 on the MXU: cast the f32 x tile to bf16 in-register (VPU work,
    # hidden under the x DMA), accumulate in f32.  D (=img_dim) need not be a
    # multiple of 128; Mosaic pads the partial lane tile for the matmul.
    x = x_ref[...].astype(jnp.bfloat16)
    h = jnp.dot(x, w1_ref[...], preferred_element_type=jnp.float32)
    h = h + b1_ref[...]                     # f32 bias, broadcast over rows
    # LeakyReLU (torch default negative_slope = 0.01): one mul + max on the VPU.
    h = jnp.maximum(h, 0.01 * h)
    # Layer 2: contract the hidden axis of both operands:
    #   (1, H) . (TB, H)^T -> (1, TB)   lane-dense row, no N=1 output column.
    # (Any XLU transpose this implies is hidden under the x DMA; layer-2 flops
    #  are ~1/800 of layer 1.)
    z = lax.dot_general(
        w2_ref[...], h,
        dimension_numbers=(((1,), (1,)), ((), ())),
        preferred_element_type=jnp.float32,
    )
    z = z + b2_ref[0, 0]                    # scalar bias from SMEM
    # Sigmoid: EUP exp + exact reciprocal (EUP slot has plenty of slack here).
    o_ref[...] = pl.reciprocal(1.0 + jnp.exp(-z)).astype(o_ref.dtype)


def discriminator_forward(x, w1, b1, w2, b2, *, batch_tile=2048):
    """x: (B, D) f32; w1: (D, H); b1: (H,) or (1,H); w2: (H, 1); b2: (1,) or (1,1)."""
    B, D = x.shape
    Din, H = w1.shape
    assert Din == D and w2.shape == (H, 1) and H % 128 == 0
    batch_tile = _round_up(batch_tile, 128)

    # Batch-tile selection:
    #   * large B:     stream (TB, D) f32 tiles, TB = batch_tile (multiple of 128)
    #   * moderate B:  split in two so both v7x TensorCores get a grid step
    #   * small B:     one tile, rounded up to a sublane multiple
    if B > batch_tile:
        TB = batch_tile
    elif B >= 1024:
        TB = _round_up(-(-B // 2), 128)
    else:
        TB = _round_up(max(B, 1), 8)
    n_steps = -(-B // TB)
    B_out = n_steps * TB                    # pad output so every store is full-width

    x = x.astype(jnp.float32)                            # no pad, no bf16 copy
    w1_bf16 = jnp.asarray(w1, jnp.bfloat16)              # (D, H), VMEM-resident
    b1_r = jnp.asarray(b1, jnp.float32).reshape(1, H)
    w2_r = jnp.asarray(w2, jnp.float32).reshape(1, H)    # column -> lane-dense row
    b2_r = jnp.asarray(b2, jnp.float32).reshape(1, 1)

    # Scoped-VMEM budget: double-buffered f32 x tiles dominate; add headroom for
    # the (TB, H) f32 intermediates and resident weights.  Capped well below the
    # v7x 64 MiB physical VMEM; raised explicitly so v5e's 16 MiB default does
    # not shrink the pipeline at TB=2048.
    vmem_est = (2 * TB * D * 4) + (2 * D * H * 2) + (4 * TB * H * 4) + (2 << 20)
    vmem_limit = int(min(max(vmem_est, 8 << 20), 48 << 20))

    out = pl.pallas_call(
        discriminator_kernel,
        out_shape=jax.ShapeDtypeStruct((1, B_out), jnp.float32),
        grid=(n_steps,),
        in_specs=[
            pl.BlockSpec((TB, D), lambda i: (i, 0)),            # x tile (pipelined, unpadded f32)
            pl.BlockSpec((D, H), lambda i: (0, 0)),             # w1 VMEM-resident
            pl.BlockSpec((1, H), lambda i: (0, 0)),             # b1 VMEM-resident
            pl.BlockSpec((1, H), lambda i: (0, 0)),             # w2 row VMEM-resident
            pl.BlockSpec(memory_space=pltpu.MemorySpace.SMEM),  # b2 scalar in SMEM
        ],
        out_specs=pl.BlockSpec((1, TB), lambda i: (0, i)),      # lane-dense slab
        compiler_params=pltpu.CompilerParams(
            dimension_semantics=("parallel",),
            vmem_limit_bytes=vmem_limit,
        ),
    )(x, w1_bf16, b1_r, w2_r, b2_r)

    return out.reshape(B_out, 1)[:B]


def reference_forward(x, w1, b1, w2, b2):
    h = x @ w1 + jnp.asarray(b1).reshape(1, -1)
    h = jnp.where(h > 0, h, 0.01 * h)
    return jax.nn.sigmoid(h @ w2 + jnp.asarray(b2).reshape(1, -1))


if __name__ == "__main__":
    key = jax.random.PRNGKey(0)
    k_x, k_w1, k_b1, k_w2, k_b2 = jax.random.split(key, 5)

    B = 8            # batch
    img_dim = 784    # flattened 28x28 image (not a multiple of 128 -> exercises partial lanes)
    H = 128
    O = 1

    lim1 = 1.0 / jnp.sqrt(img_dim)
    lim2 = 1.0 / jnp.sqrt(H)
    x = jax.random.normal(k_x, (B, img_dim), dtype=jnp.float32)
    w1 = jax.random.uniform(k_w1, (img_dim, H), minval=-lim1, maxval=lim1, dtype=jnp.float32)
    b1 = jax.random.uniform(k_b1, (1, H), minval=-lim1, maxval=lim1, dtype=jnp.float32)
    w2 = jax.random.uniform(k_w2, (H, O), minval=-lim2, maxval=lim2, dtype=jnp.float32)
    b2 = jax.random.uniform(k_b2, (1, O), minval=-lim2, maxval=lim2, dtype=jnp.float32)

    out = jax.block_until_ready(discriminator_forward(x, w1, b1, w2, b2))
    ref = reference_forward(x, w1, b1, w2, b2)

    assert out.shape == (B, O), out.shape
    max_err = float(jnp.max(jnp.abs(out - ref)))
    # bf16 layer-1 operands => compare loosely against the f32 reference.
    assert max_err < 2e-2, f"mismatch vs reference: max_abs_err={max_err}"

    print("KERNEL_OK")
</pallas_src>

<mosaic_0001>
module attributes {stable_mosaic.version = 11 : i64} {
  func.func @discriminator_kernel(%arg0: i32, %arg1: memref<8x784xf32, #tpu.memory_space<vmem>>, %arg2: memref<784x128xbf16, #tpu.memory_space<vmem>>, %arg3: memref<1x128xf32, #tpu.memory_space<vmem>>, %arg4: memref<1x128xf32, #tpu.memory_space<vmem>>, %arg5: memref<1x1xf32, #tpu.memory_space<smem>>, %arg6: memref<1x8xf32, #tpu.memory_space<vmem>>) attributes {dimension_semantics = [#tpu.dimension_semantics<parallel>], iteration_bounds = array<i64: 1>, scalar_prefetch = 0 : i64, scratch_operands = 0 : i64, tpu.core_type = #tpu.core_type<tc>, window_params = [{transform_indices = @transform_0, window_bounds = array<i64: 8, 784>}, {pipeline_mode = #tpu.pipeline_mode<synchronous>, transform_indices = @transform_1, window_bounds = array<i64: 784, 128>}, {pipeline_mode = #tpu.pipeline_mode<synchronous>, transform_indices = @transform_2, window_bounds = array<i64: 1, 128>}, {pipeline_mode = #tpu.pipeline_mode<synchronous>, transform_indices = @transform_3, window_bounds = array<i64: 1, 128>}, {transform_indices = @transform_4, window_bounds = array<i64: 1, 1>}, {transform_indices = @transform_5, window_bounds = array<i64: 1, 8>}]} {
    %c0 = arith.constant 0 : index
    %c0_0 = arith.constant 0 : index
    %0 = vector.load %arg1[%c0, %c0_0] : memref<8x784xf32, #tpu.memory_space<vmem>>, vector<8x784xf32>
    %1 = arith.truncf %0 : vector<8x784xf32> to vector<8x784xbf16>
    %c0_1 = arith.constant 0 : index
    %c0_2 = arith.constant 0 : index
    %2 = vector.load %arg2[%c0_1, %c0_2] : memref<784x128xbf16, #tpu.memory_space<vmem>>, vector<784x128xbf16>
    %cst = arith.constant dense<0.000000e+00> : vector<8x128xf32>
    %3 = tpu.matmul %1, %2, %cst {dimension_numbers = #tpu.dot_dimension_numbers<[1], [0], [0], [1], [0, 0, 1, 1], [], []>} : vector<8x784xbf16>, vector<784x128xbf16>, vector<8x128xf32> -> vector<8x128xf32>
    %c0_3 = arith.constant 0 : index
    %c0_4 = arith.constant 0 : index
    %4 = vector.load %arg3[%c0_3, %c0_4] : memref<1x128xf32, #tpu.memory_space<vmem>>, vector<1x128xf32>
    %5 = vector.broadcast %4 : vector<1x128xf32> to vector<8x128xf32>
    %6 = arith.addf %3, %5 : vector<8x128xf32>
    %cst_5 = arith.constant 0.00999999977 : f32
    %7 = vector.broadcast %cst_5 : f32 to vector<8x128xf32>
    %8 = arith.mulf %7, %6 : vector<8x128xf32>
    %9 = arith.maximumf %6, %8 : vector<8x128xf32>
    %c0_6 = arith.constant 0 : index
    %c0_7 = arith.constant 0 : index
    %10 = vector.load %arg4[%c0_6, %c0_7] : memref<1x128xf32, #tpu.memory_space<vmem>>, vector<1x128xf32>
    %cst_8 = arith.constant dense<0.000000e+00> : vector<1x8xf32>
    %11 = tpu.matmul %10, %9, %cst_8 {dimension_numbers = #tpu.dot_dimension_numbers<[1], [1], [0], [0], [0, 0, 1, 0], [], []>} : vector<1x128xf32>, vector<8x128xf32>, vector<1x8xf32> -> vector<1x8xf32>
    %c0_9 = arith.constant 0 : index
    %c0_10 = arith.constant 0 : index
    %12 = memref.load %arg5[%c0_9, %c0_10] : memref<1x1xf32, #tpu.memory_space<smem>>
    %13 = vector.broadcast %12 : f32 to vector<1x8xf32>
    %14 = arith.addf %11, %13 : vector<1x8xf32>
    %cst_11 = arith.constant 0.000000e+00 : f32
    %15 = vector.broadcast %cst_11 : f32 to vector<1x8xf32>
    %16 = arith.subf %15, %14 : vector<1x8xf32>
    %17 = math.exp %16 : vector<1x8xf32>
    %cst_12 = arith.constant 1.000000e+00 : f32
    %18 = vector.broadcast %cst_12 : f32 to vector<1x8xf32>
    %19 = arith.addf %18, %17 : vector<1x8xf32>
    %20 = tpu.reciprocal %19 : vector<1x8xf32> -> vector<1x8xf32>
    %c0_13 = arith.constant 0 : index
    %c0_14 = arith.constant 0 : index
    %21 = vector.load %arg6[%c0_13, %c0_14] : memref<1x8xf32, #tpu.memory_space<vmem>>, vector<1x8xf32>
    tpu.vector_store %arg6[%c0_13, %c0_14], %20 {strides = array<i32>} : memref<1x8xf32, #tpu.memory_space<vmem>>, vector<1x8xf32>,
    return
  }
  func.func @transform_0(%arg0: i32) -> (i32, i32) {
    %c0_i32 = arith.constant 0 : i32
    %c0_i32_0 = arith.constant 0 : i32
    return %arg0, %c0_i32 : i32, i32
  }
  func.func @transform_1(%arg0: i32) -> (i32, i32) {
    %c0_i32 = arith.constant 0 : i32
    %c0_i32_0 = arith.constant 0 : i32
    %c0_i32_1 = arith.constant 0 : i32
    return %c0_i32, %c0_i32_0 : i32, i32
  }
  func.func @transform_2(%arg0: i32) -> (i32, i32) {
    %c0_i32 = arith.constant 0 : i32
    %c0_i32_0 = arith.constant 0 : i32
    %c0_i32_1 = arith.constant 0 : i32
    return %c0_i32, %c0_i32_0 : i32, i32
  }
  func.func @transform_3(%arg0: i32) -> (i32, i32) {
    %c0_i32 = arith.constant 0 : i32
    %c0_i32_0 = arith.constant 0 : i32
    %c0_i32_1 = arith.constant 0 : i32
    return %c0_i32, %c0_i32_0 : i32, i32
  }
  func.func @transform_4(%arg0: i32) -> (i32, i32) {
    %c0_i32 = arith.constant 0 : i32
    %c0_i32_0 = arith.constant 0 : i32
    %c0_i32_1 = arith.constant 0 : i32
    return %c0_i32, %c0_i32_0 : i32, i32
  }
  func.func @transform_5(%arg0: i32) -> (i32, i32) {
    %c0_i32 = arith.constant 0 : i32
    %c0_i32_0 = arith.constant 0 : i32
    return %c0_i32, %arg0 : i32, i32
  }
}

</mosaic_0001>

<bundles_post_ra>
// kernel: tpu_custom_call.1
= control target key start
LH: loop header
LB: loop body
LE: loop exit
PB: predicated region body
PF: predicated region fallthrough
CT: control target
= control target key end

     0   :  { %11 = vsyncpa [#allocation4], 0  ;;  %s1008_s0 = inlined_call_operand.hbm [shape: f32[8,784], index: 0, kind: input, shape index: {}]   ;;  %s1009_s1 = inlined_call_operand.hbm [shape: bf16[784,128], index: 1, kind: input, shape index: {}]   ;;  %s1010_s2 = inlined_call_operand.vmem [shape: f32[1,128], index: 2, kind: input, shape index: {}]   ;;  %s1011_s3 = inlined_call_operand.vmem [shape: f32[1,128], index: 3, kind: input, shape index: {}]   ;;  %s1012_s4 = inlined_call_operand.<no memory space> [shape: f32[1,1], index: 4, kind: input, shape index: {}]   ;;  %s1013_s5 = inlined_call_operand.hbm [shape: f32[1,8], index: 5, kind: output, shape index: {}]  }
   0x1   :  { %12 = vsyncpa [#allocation7], 0 }
   0x2   :  { %13 = vsyncpa [#allocation5], 0  ;;  %s19_s20 = sshll.u32 %s1008_s0, 4  ;;  %s955_s21 = smov [#allocation3]   ;;  %s20_s20 = int_to_ptr.hbm [resolvable:$true] %s19_s20 }
   0x3   :  { %s21_s22 = sshll.u32 %s955_s21, 4  ;;  %s29_s25 = sshll.u32 %s1009_s1, 4  ;;  %s22_s22 = int_to_ptr.vmem [resolvable:$true] %s21_s22  ;;  %s30_s25 = int_to_ptr.hbm [resolvable:$true] %s29_s25 }
   0x4   :  { %24 = dma.hbm_to_vmem [thread:$0]  %s20_s20, 896, %s22_s22, [#allocation4]  }
   0x5   :  { %s956_s26 = smov [#allocation6]   ;;  %s957_s28 = smov 64  }
   0x6   :  { %s31_s27 = sshll.u32 %s956_s26, 4  ;;  %s958_s29 = smov 4   ;;  %s32_s27 = int_to_ptr.vmem [resolvable:$true] %s31_s27 }
   0x7   :  { %37 = dma.hbm_to_vmem [thread:$0]  %s30_s25, 6272, %s32_s27, [#allocation7], %s957_s28, %s957_s28, %s958_s29  }
   0x8   :  { %949 = dma.done.wait [#allocation4], 896  }
   0x9   :  { %950 = vsyncadd [#allocation4], 4294966400 }
   0xa   :  { %951 = dma.done.wait [#allocation7], 6272  }
   0xb   :  { %952 = vsyncadd [#allocation7], 4294961024  ;;  %v825_v0 = vld [vmem:[#allocation6 + $0x38] sm:$0xff]  ;;  %v824_v3 = vld [vmem:[#allocation6 + $0x30] sm:$0xff]  ;;  %vm463_vm0 = vcmask 130048   ;;  %vm601_vm4 = vcmask 57344  }
   0xc   :  { %v833_v1 = vld [vmem:[#allocation6 + $0x78] sm:$0xff]  ;;  %467 = vmatpush.bf16.msra.mxu0 %v825_v0  ;;  %v832_v4 = vld [vmem:[#allocation6 + $0x70] sm:$0xff]  ;;  %v823_v8 = vld [vmem:[#allocation6 + $0x28] sm:$0xff] }
   0xd   :  { %v841_v2 = vld [vmem:[#allocation6 + $0xb8] sm:$0xff]  ;;  %480 = vmatpush.bf16.msra.mxu1 %v833_v1  ;;  %v840_v5 = vld [vmem:[#allocation6 + $0xb0] sm:$0xff]  ;;  %v831_v9 = vld [vmem:[#allocation6 + $0x68] sm:$0xff] }
   0xe   :  { %493 = vmatpush.bf16.msra.mxu2 %v841_v2  ;;  %v849_v6 = vld [vmem:[#allocation6 + $0xf8] sm:$0xff]  ;;  %v848_v7 = vld [vmem:[#allocation6 + $0xf0] sm:$0xff]  ;;  %v839_v10 = vld [vmem:[#allocation6 + $0xa8] sm:$0xff] }
   0xf   :  { %506 = vmatpush.bf16.msra.mxu3 %v849_v6  ;;  %v847_v11 = vld [vmem:[#allocation6 + $0xe8] sm:$0xff]  ;;  %v822_v12 = vld [vmem:[#allocation6 + $0x20] sm:$0xff]  ;;  %v821_v16 = vld [vmem:[#allocation6 + $0x18] sm:$0xff] }
  0x10   :  { %468 = vmatpush.bf16.msra.mxu0 %v824_v3  ;;  %v830_v13 = vld [vmem:[#allocation6 + $0x60] sm:$0xff]  ;;  %v829_v17 = vld [vmem:[#allocation6 + $0x58] sm:$0xff]  ;;  %v820_v20 = vld [vmem:[#allocation6 + $0x10] sm:$0xff] }
  0x11   :  { %481 = vmatpush.bf16.msra.mxu1 %v832_v4  ;;  %v838_v14 = vld [vmem:[#allocation6 + $0xa0] sm:$0xff]  ;;  %v837_v18 = vld [vmem:[#allocation6 + $0x98] sm:$0xff]  ;;  %v828_v21 = vld [vmem:[#allocation6 + $0x50] sm:$0xff] }
  0x12   :  { %494 = vmatpush.bf16.msra.mxu2 %v840_v5  ;;  %v846_v15 = vld [vmem:[#allocation6 + $0xe0] sm:$0xff]  ;;  %v845_v19 = vld [vmem:[#allocation6 + $0xd8] sm:$0xff]  ;;  %v836_v22 = vld [vmem:[#allocation6 + $0x90] sm:$0xff] }
  0x13   :  { %507 = vmatpush.bf16.msra.mxu3 %v848_v7  ;;  %v844_v23 = vld [vmem:[#allocation6 + $0xd0] sm:$0xff]  ;;  %v819_v24 = vld [vmem:[#allocation6 + $0x8] sm:$0xff]  ;;  %v818_v27 = vld [vmem:[#allocation6] sm:$0xff] }
  0x14   :  { %469 = vmatpush.bf16.msra.mxu0 %v823_v8  ;;  %v827_v25 = vld [vmem:[#allocation6 + $0x48] sm:$0xff]  ;;  %v826_v29 = vld [vmem:[#allocation6 + $0x40] sm:$0xff]  ;;  %v54_v31 = vld [vmem:[#allocation3 + $0x8] sm:$0xff] }
  0x15   :  { %482 = vmatpush.bf16.msra.mxu1 %v831_v9  ;;  %v835_v26 = vld [vmem:[#allocation6 + $0x88] sm:$0xff]  ;;  %v857_v32 = vld [vmem:[#allocation6 + $0x138] sm:$0xff]  ;;  %v834_v34 = vld [vmem:[#allocation6 + $0x80] sm:$0xff]  ;;  %v61_v37 = vpack.c.bf16 %v54_v31, %v54_v31 }
  0x16   :  { %495 = vmatpush.bf16.msra.mxu2 %v839_v10  ;;  %v843_v28 = vld [vmem:[#allocation6 + $0xc8] sm:$0xff]  ;;  %v865_v33 = vld [vmem:[#allocation6 + $0x178] sm:$0xff]  ;;  %v842_v38 = vld [vmem:[#allocation6 + $0xc0] sm:$0xff] }
  0x17   :  { %508 = vmatpush.bf16.msra.mxu3 %v847_v11  ;;  %v53_v30 = vld [vmem:[#allocation3] sm:$0xff]  ;;  %v55_v35 = vld [vmem:[#allocation3 + $0x10] sm:$0xff]  ;;  %v56_v39 = vld [vmem:[#allocation3 + $0x18] sm:$0xff] }
  0x18   :  { %470 = vmatpush.bf16.msra.mxu0 %v822_v12  ;;  %v60_v36 = vpack.c.bf16 %v53_v30, %v53_v30  ;;  %v866_v40 = vld [vmem:[#allocation6 + $0x180] sm:$0xff]  ;;  %v856_v41 = vld [vmem:[#allocation6 + $0x130] sm:$0xff]  ;;  %v62_v43 = vpack.c.bf16 %v55_v35, %v55_v35  ;;  %v63_v44 = vpack.c.bf16 %v56_v39, %v56_v39  ;;  %v855_v45 = vld [vmem:[#allocation6 + $0x128] sm:$0xff] }
  0x19   :  { %483 = vmatpush.bf16.msra.mxu1 %v830_v13  ;;  %v864_v42 = vld [vmem:[#allocation6 + $0x170] sm:$0xff]  ;;  %v863_v46 = vld [vmem:[#allocation6 + $0x168] sm:$0xff]  ;;  %v854_v47 = vld [vmem:[#allocation6 + $0x120] sm:$0xff] }
  0x1a   :  { %496 = vmatpush.bf16.msra.mxu2 %v838_v14  ;;  %v862_v48 = vld [vmem:[#allocation6 + $0x160] sm:$0xff]  ;;  %v853_v49 = vld [vmem:[#allocation6 + $0x118] sm:$0xff]  ;;  %v852_v52 = vld [vmem:[#allocation6 + $0x110] sm:$0xff] }
  0x1b   :  { %509 = vmatpush.bf16.msra.mxu3 %v846_v15  ;;  %v861_v50 = vld [vmem:[#allocation6 + $0x158] sm:$0xff]  ;;  %v860_v53 = vld [vmem:[#allocation6 + $0x150] sm:$0xff]  ;;  %v851_v55 = vld [vmem:[#allocation6 + $0x108] sm:$0xff] }
  0x1c   :  { %471 = vmatpush.bf16.msra.mxu0 %v821_v16  ;;  %v59_v51 = vld [vmem:[#allocation3 + $0x30] sm:$0xff]  ;;  %v859_v56 = vld [vmem:[#allocation6 + $0x148] sm:$0xff]  ;;  %v850_v57 = vld [vmem:[#allocation6 + $0x100] sm:$0xff] }
  0x1d   :  { %484 = vmatpush.bf16.msra.mxu1 %v829_v17  ;;  %v66_v54 = vpack.c.bf16 %v59_v51, %v59_v51  ;;  %v858_v58 = vld [vmem:[#allocation6 + $0x140] sm:$0xff]  ;;  %v57_v59 = vld [vmem:[#allocation3 + $0x20] sm:$0xff]  ;;  %v58_v60 = vld [vmem:[#allocation3 + $0x28] sm:$0xff] }
  0x1e   :  { %497 = vmatpush.bf16.msra.mxu2 %v837_v18  ;;  %v64_v61 = vpack.c.bf16 %v57_v59, %v57_v59  ;;  %v65_v62 = vpack.c.bf16 %v58_v60, %v58_v60  ;;  %v872_v5 = vld [vmem:[%s1010_s2] ss:$0 sm:$0xff] }
  0x1f   :  { %510 = vmatpush.bf16.msra.mxu3 %v845_v19 }
  0x20   :  { %472 = vmatpush.bf16.msra.mxu0 %v820_v20 }
  0x21   :  { %485 = vmatpush.bf16.msra.mxu1 %v828_v21 }
  0x22   :  { %498 = vmatpush.bf16.msra.mxu2 %v836_v22 }
  0x23   :  { %511 = vmatpush.bf16.msra.mxu3 %v844_v23  ;;  %v560_v23 = vld [vmem:[%s1011_s3] sm:$0x1]  ;;  %s959_s3 = smov [#allocation8]  }
  0x24   :  { %473 = vmatpush.bf16.msra.mxu0 %v819_v24  ;;  %v562_v24 = vstv %s1012_s4  ;;  %s608_s8 = sshll.u32 %s959_s3, 4  ;;  %s610_s4 = sshll.u32 %s1013_s5, 4  ;;  %s609_s8 = int_to_ptr.vmem [resolvable:$true] %s608_s8  ;;  %s611_s4 = int_to_ptr.hbm [resolvable:$true] %s610_s4 }
  0x25   :  { %486 = vmatpush.bf16.msra.mxu1 %v827_v25 }
  0x26   :  { %499 = vmatpush.bf16.msra.mxu2 %v835_v26 }
  0x27   :  { %512 = vmatpush.bf16.msra.mxu3 %v843_v28 }
  0x28   :  { %474 = vmatpush.bf16.msra.mxu0 %v818_v27 }
  0x29   :  { %487 = vmatpush.bf16.msra.mxu1 %v826_v29 }
  0x2a   :  { %500 = vmatpush.bf16.msra.mxu2 %v834_v34 }
  0x2b   :  { %475 = vmatmul.bf16.vlgmr.msra.gmra.mxu0 %v60_v36  ;;  %513 = vmatpush.bf16.msra.mxu3 %v842_v38 }
  0x2c   :  { %519 = vmatpush.bf16.msrb.mxu0 %v857_v32  ;;  %488 = vmatmul.bf16.vlgmr.msra.gmra.mxu1 %v61_v37 }
  0x2d   :  { %532 = vmatpush.bf16.msrb.mxu1 %v865_v33  ;;  %501 = vmatmul.bf16.vlgmr.msra.gmra.mxu2 %v62_v43 }
  0x2e   :  { %552 = vmatpush.bf16.msrb.mxu2 %v866_v40  ;;  %514 = vmatmul.bf16.vlgmr.msra.gmra.mxu3 %v63_v44 }
  0x30   :  { %520 = vmatpush.bf16.msrb.mxu0 %v856_v41 }
  0x31   :  { %533 = vmatpush.bf16.msrb.mxu1 %v864_v42 }
  0x34   :  { %521 = vmatpush.bf16.msrb.mxu0 %v855_v45 }
  0x35   :  { %534 = vmatpush.bf16.msrb.mxu1 %v863_v46 }
  0x38   :  { %522 = vmatpush.bf16.msrb.mxu0 %v854_v47 }
  0x39   :  { %535 = vmatpush.bf16.msrb.mxu1 %v862_v48 }
  0x3c   :  { %523 = vmatpush.bf16.msrb.mxu0 %v853_v49 }
  0x3d   :  { %536 = vmatpush.bf16.msrb.mxu1 %v861_v50  ;;  %817 = vmatmul.msk.bf16.vlgmr.msrb.gmra.mxu2 %vm463_vm0, %v66_v54 }
  0x40   :  { %524 = vmatpush.bf16.msrb.mxu0 %v852_v52 }
  0x41   :  { %537 = vmatpush.bf16.msrb.mxu1 %v860_v53 }
  0x44   :  { %525 = vmatpush.bf16.msrb.mxu0 %v851_v55 }
  0x45   :  { %538 = vmatpush.bf16.msrb.mxu1 %v859_v56 }
  0x48   :  { %526 = vmatpush.bf16.msrb.mxu0 %v850_v57 }
  0x49   :  { %539 = vmatpush.bf16.msrb.mxu1 %v858_v58 }
  0x4b   :  { %527 = vmatmul.bf16.vlgmr.msrb.gmra.mxu0 %v64_v61 }
  0x4c   :  { %540 = vmatmul.bf16.vlgmr.msrb.gmra.mxu1 %v65_v62 }
  0xa8   :  { %v476_v63 = vpop.f32.mrf.mxu0 }
  0xa9   :  { %v489_v0 = vpop.f32.mrf.mxu1  ;;  %v477_v6 = vadd.f32 %v872_v5, %v476_v63 }
  0xab   :  { %v490_v9 = vadd.f32 %v489_v0, %v477_v6 }
  0xb0   :  { %v478_v1 = vpop.f32.mrf.mxu0  ;;  %v502_v3 = vpop.f32.mrf.mxu2 }
  0xb1   :  { %v491_v2 = vpop.f32.mrf.mxu1  ;;  %v515_v4 = vpop.f32.mrf.mxu3  ;;  %v503_v10 = vadd.f32 %v502_v3, %v490_v9 }
  0xb3   :  { %v516_v12 = vadd.f32 %v515_v4, %v503_v10 }
  0xb8   :  { %v504_v7 = vpop.f32.mrf.mxu2 }
  0xb9   :  { %v517_v8 = vpop.f32.mrf.mxu3 }
  0xc0   :  { %v554_v11 = vpop.f32.mrf.mxu2 }
  0xc8   :  { %v528_v13 = vpop.f32.mrf.mxu0  ;;  %v556_v17 = vpop.f32.mrf.mxu2 }
  0xc9   :  { %v541_v14 = vpop.f32.mrf.mxu1  ;;  %v529_v15 = vadd.f32 %v528_v13, %v516_v12 }
  0xcb   :  { %v542_v16 = vadd.f32 %v541_v14, %v529_v15 }
  0xcd   :  { %v555_v18 = vadd.f32 %v554_v11, %v542_v16 }
  0xcf   :  { %v558_v19 = vmul.f32 0.01, %v555_v18 }
  0xd0   :  { %v530_v20 = vpop.f32.mrf.mxu0 }
  0xd1   :  { %v543_v21 = vpop.f32.mrf.mxu1  ;;  %v559_v22 = vmax.f32 %v555_v18, %v558_v19 }
  0xd3   :  { %578 = vmatpush.xpose.msrb.mxu3 %v559_v22 }
  0xd6   :  { %579 = vmatmul.f32.vlgmr.msrb.gmra.mxu3 %v560_v23 }
 0x159   :  { %v580_v25 = vpop.f32.mrf.mxu3 }
 0x15a   :  { %v581_v26 = vadd.f32 %v580_v25, %v562_v24 }
 0x15c   :  { %v583_v27 = vsub.f32 0.0, %v581_v26 }
 0x15e   :  { %v584_v28 = vmul.f32 1.442695, %v583_v27 }
 0x160   :  { %873 = vpow2.f32 %v584_v28 }
 0x166   :  { %v874_v29 = vpop.eup %873 }
 0x167   :  { %v586_v30 = vadd.f32 1.0, %v874_v29 }
 0x169   :  { %875 = vrcp.f32 %v586_v30  ;;  %v598_v34 = vand.u32 2147483648, %v586_v30  ;;  %v596_v36 = vand.u32 2147483647, %v586_v30  ;;  %vm592_vm2 = vweird.f32 %v586_v30 }
 0x16b   :  { %v599_v38 = vor.u32 1.1754944e-38, %v598_v34  ;;  %vm597_vm5 = vcmp.eq.f32.partialorder %v596_v36, 8.507059e+37 }
 0x16f   :  { %v876_v31 = vpop.eup %875 }
 0x170   :  { %v588_v32 = vmul.f32 %v876_v31, %v586_v30  ;;  %vm593_vm1 = vweird.f32 %v876_v31 }
 0x171   :  { %vm594_vm3 = vmor %vm592_vm2, %vm593_vm1 }
 0x172   :  { %v589_v33 = vsub.f32 1.0, %v588_v32 }
 0x174   :  { %v590_v35 = vmul.f32 %v876_v31, %v589_v33 }
 0x176   :  { %v591_v37 = vadd.f32 %v876_v31, %v590_v35 }
 0x178   :  { %v595_v39 = vsel %vm594_vm3, %v876_v31, %v591_v37 }
 0x179   :  { %v600_v40 = vsel %vm597_vm5, %v599_v38, %v595_v39 }
 0x17a   :  { %602 = vst.msk [vmem:[#allocation8] sm:$0x1] %vm601_vm4, %v600_v40 }
 0x17b   :  { %613 = dma.vmem_to_hbm [thread:$0]  %s609_s8, 16, %s611_s4, [#allocation5]  }
 0x17c   :  { %953 = dma.done.wait [#allocation5], 16  }
 0x17d   :  { %954 = vsyncadd [#allocation5], 4294967280 }
 0x17e   :  { %618 = vsyncpa [#allocation4], 1 }
 0x17f   :  { %619 = vsyncpa [#allocation7], 1 }
 0x180   :  { %620 = vsyncpa [#allocation5], 1 }

</bundles_post_ra>
